<compile_context>
chip_gen: v7x
topology: tpu7x:2x2x1
jax: 0.10.0
libtpu: 0.0.40
codegen_flags: <defaults>
</compile_context>

<pallas_src>
import functools

import jax
import jax.numpy as jnp
from jax import lax
from jax.experimental import pallas as pl
from jax.experimental.pallas import tpu as pltpu


def _cdiv(a, b):
    return -(-a // b)


def _round_up(x, m):
    return _cdiv(x, m) * m


def _pool_kernel(mask_ref, feat_ref, out_ref, *, inv_hw, compute_dtype):
    # mask_ref: (Bn, M, HW)   native input dtype (e.g. f32)
    # feat_ref: (Bn, Td, HW)  native input dtype -- no wrapper cast/transpose
    # out_ref : (Bn, Td, M)   f32
    feat = feat_ref[...].astype(compute_dtype)   # VPU cast; no-op if already bf16
    mask = mask_ref[...].astype(compute_dtype)
    # feat is the MXU LHS (contraction HW on its last axis, native layout); the tiny
    # mask tile is the RHS (Mosaic transposes the M x HW tile on the XLU -- free here).
    acc = lax.dot_general(
        feat, mask,
        dimension_numbers=(((2,), (2,)), ((0,), (0,))),
        preferred_element_type=jnp.float32,
    )                                            # (Bn, Td, M), f32 accumulation
    out_ref[...] = (acc * inv_hw).astype(out_ref.dtype)


def _vmem_limit_bytes():
    """Per-generation scoped-VMEM limit (with headroom); conservative fallback."""
    try:
        cap = int(pltpu.get_tpu_info().vmem_capacity_bytes)
    except Exception:
        cap = 64 * 1024 * 1024  # conservative: v7x per-TensorCore VMEM size
    # v5e/v6e (128 MiB physical) -> 64 MiB; v7x (64 MiB per TC) -> 48 MiB.
    return min((cap * 3) // 4, 64 * 1024 * 1024)


def global_mask_weighted_pooling_head(
    features,
    part_masks,
    *,
    compute_dtype=jnp.bfloat16,
    out_dtype=jnp.float32,
    block_n=None,
    tile_d=None,
):
    """features: [N, D, H, W], part_masks: [N, M, H, W] -> [N, M, D] (identity norm)."""
    N, D, H, W = features.shape
    Nm, M, Hm, Wm = part_masks.shape
    assert (N, H, W) == (Nm, Hm, Wm)
    HW = H * W

    # TODO(synk): only the default 'identity' normalization path is implemented;
    # the batch_norm_{1,2,3}d variants (running-stat BatchNorm) are not.

    # Free reshapes only -- no transpose / cast / pad pass over the big feature tensor.
    feat = features.reshape(N, D, HW)      # native NCHW-flat: HW contiguous (lanes)
    mask = part_masks.reshape(N, M, HW)

    f_bytes = jnp.dtype(feat.dtype).itemsize
    m_bytes = jnp.dtype(mask.dtype).itemsize
    o_bytes = jnp.dtype(out_dtype).itemsize

    vmem_limit = _vmem_limit_bytes()
    # Double-buffered working set targets ~vmem_limit/2, i.e. per-step blocks of
    # ~vmem_limit/4 (~16 MiB/step on v5e/v6e, ~12 MiB/step on v7x) with headroom
    # left for compiler-internal scratch.
    per_step_budget = vmem_limit // 4

    # D tiling: default to the full D (fully contiguous per-sample feature DMA, no
    # mask refetch, fewer grid steps); only tile when a single sample overflows.
    D_pad = D
    if tile_d is None:
        one_sample = D * HW * f_bytes + M * HW * m_bytes + M * D * o_bytes
        if one_sample <= per_step_budget or D <= 128:
            tile_d = D
        else:
            avail = max(per_step_budget - M * HW * m_bytes, 0)
            fit = avail // (HW * f_bytes + M * o_bytes)
            tile_d = max(128, (min(fit, D) // 128) * 128)
    if tile_d != D:
        D_pad = _round_up(D, tile_d)
        if D_pad != D:
            # Rare path (very large D only): pad so tile_d divides D.
            feat = jnp.pad(feat, ((0, 0), (0, D_pad - D), (0, 0)))
    d_tiles = D_pad // tile_d

    per_sample_bytes = tile_d * HW * f_bytes + M * HW * m_bytes + M * tile_d * o_bytes
    if block_n is None:
        block_n = max(1, min(N, per_step_budget // max(per_sample_bytes, 1)))
        # v7x megacore: keep >= 2 parallel grid points so both TensorCores are fed.
        if N >= 2 and d_tiles * _cdiv(N, block_n) < 2:
            block_n = _cdiv(N, 2)
    block_n = max(1, min(block_n, N))
    n_tiles = _cdiv(N, block_n)            # ragged last N-block handled by Pallas
    grid = (n_tiles, d_tiles)              # d innermost -> mask block stays resident

    kernel = functools.partial(
        _pool_kernel, inv_hw=1.0 / HW, compute_dtype=compute_dtype
    )

    cost = pl.CostEstimate(
        flops=2 * N * M * HW * D,
        transcendentals=0,
        bytes_accessed=(
            N * D * HW * f_bytes + N * M * HW * m_bytes + N * M * D * o_bytes
        ),
    )

    # Kernel emits [N, D, M]; the tiny transpose back to [N, M, D] happens in XLA
    # (output is ~M/HW of the feature traffic, so this is noise).
    out_ndm = pl.pallas_call(
        kernel,
        out_shape=jax.ShapeDtypeStruct((N, D_pad, M), out_dtype),
        grid_spec=pltpu.PrefetchScalarGridSpec(
            num_scalar_prefetch=0,
            grid=grid,
            in_specs=[
                # masks: block index constant across d -> no re-DMA across d-tiles
                pl.BlockSpec((block_n, M, HW), lambda n, d: (n, 0, 0)),
                # features: native [N, D, HW] layout, contraction axis HW last
                pl.BlockSpec((block_n, tile_d, HW), lambda n, d: (n, d, 0)),
            ],
            out_specs=pl.BlockSpec((block_n, tile_d, M), lambda n, d: (n, d, 0)),
        ),
        compiler_params=pltpu.CompilerParams(
            dimension_semantics=("parallel", "parallel"),
            vmem_limit_bytes=vmem_limit,
        ),
        cost_estimate=cost,
    )(mask, feat)

    if D_pad != D:
        out_ndm = out_ndm[:, :D, :]
    return jnp.swapaxes(out_ndm, 1, 2)     # [N, M, D]


def _reference(features, part_masks):
    # Pure-JAX f32 mirror of the PyTorch forward (identity norm + global avg pool).
    pm = part_masks[:, :, None, :, :]          # [N, M, 1, H, W]
    ft = features[:, None, :, :, :]            # [N, 1, D, H, W]
    parts = pm * ft                            # [N, M, D, H, W]
    return parts.mean(axis=(-2, -1))           # [N, M, D]


if __name__ == "__main__":
    key = jax.random.PRNGKey(0)
    k1, k2 = jax.random.split(key)

    N, D, H, W = 2, 4, 16, 16   # batch, depth (channels), spatial
    M = 5                       # number of part masks

    features = jax.random.normal(k1, (N, D, H, W), dtype=jnp.float32)
    part_masks = jax.nn.softmax(
        jax.random.normal(k2, (N, M, H, W), dtype=jnp.float32), axis=1)

    out = global_mask_weighted_pooling_head(features, part_masks)
    out = jax.block_until_ready(out)

    ref = _reference(features, part_masks)
    assert out.shape == (N, M, D), out.shape
    # bf16 in-kernel cast + f32 MXU accumulation: small drift vs the pure-f32 reference.
    assert jnp.allclose(out, ref, atol=1e-2, rtol=1e-2), (
        float(jnp.max(jnp.abs(out - ref))))

    print("KERNEL_OK")
</pallas_src>

<mosaic_0001>
module attributes {stable_mosaic.version = 11 : i64} {
  func.func @_pool_kernel(%arg0: i32, %arg1: i32, %arg2: memref<1x5x256xf32, #tpu.memory_space<vmem>>, %arg3: memref<1x4x256xf32, #tpu.memory_space<vmem>>, %arg4: memref<1x4x5xf32, #tpu.memory_space<vmem>>) attributes {dimension_semantics = [#tpu.dimension_semantics<parallel>, #tpu.dimension_semantics<parallel>], iteration_bounds = array<i64: 2, 1>, scalar_prefetch = 0 : i64, scratch_operands = 0 : i64, tpu.core_type = #tpu.core_type<tc>, window_params = [{transform_indices = @transform_0, window_bounds = array<i64: 1, 5, 256>}, {transform_indices = @transform_1, window_bounds = array<i64: 1, 4, 256>}, {transform_indices = @transform_2, window_bounds = array<i64: 1, 4, 5>}]} {
    %c0 = arith.constant 0 : index
    %c0_0 = arith.constant 0 : index
    %c0_1 = arith.constant 0 : index
    %0 = vector.load %arg3[%c0, %c0_0, %c0_1] : memref<1x4x256xf32, #tpu.memory_space<vmem>>, vector<1x4x256xf32>
    %1 = arith.truncf %0 : vector<1x4x256xf32> to vector<1x4x256xbf16>
    %c0_2 = arith.constant 0 : index
    %c0_3 = arith.constant 0 : index
    %c0_4 = arith.constant 0 : index
    %2 = vector.load %arg2[%c0_2, %c0_3, %c0_4] : memref<1x5x256xf32, #tpu.memory_space<vmem>>, vector<1x5x256xf32>
    %3 = arith.truncf %2 : vector<1x5x256xf32> to vector<1x5x256xbf16>
    %cst = arith.constant dense<0.000000e+00> : vector<1x4x5xf32>
    %4 = tpu.matmul %1, %3, %cst {dimension_numbers = #tpu.dot_dimension_numbers<[2], [2], [1], [1], [0, 0, 0, 1, 1, 1], [0], [0]>} : vector<1x4x256xbf16>, vector<1x5x256xbf16>, vector<1x4x5xf32> -> vector<1x4x5xf32>
    %cst_5 = arith.constant 3.906250e-03 : f32
    %5 = vector.broadcast %cst_5 : f32 to vector<1x4x5xf32>
    %6 = arith.mulf %4, %5 : vector<1x4x5xf32>
    %c0_6 = arith.constant 0 : index
    %c0_7 = arith.constant 0 : index
    %c0_8 = arith.constant 0 : index
    %7 = vector.load %arg4[%c0_6, %c0_7, %c0_8] : memref<1x4x5xf32, #tpu.memory_space<vmem>>, vector<1x4x5xf32>
    tpu.vector_store %arg4[%c0_6, %c0_7, %c0_8], %6 {strides = array<i32>} : memref<1x4x5xf32, #tpu.memory_space<vmem>>, vector<1x4x5xf32>,
    return
  }
  func.func @transform_0(%arg0: i32, %arg1: i32) -> (i32, i32, i32) {
    %c0_i32 = arith.constant 0 : i32
    %c0_i32_0 = arith.constant 0 : i32
    %c0_i32_1 = arith.constant 0 : i32
    return %arg0, %c0_i32, %c0_i32_0 : i32, i32, i32
  }
  func.func @transform_1(%arg0: i32, %arg1: i32) -> (i32, i32, i32) {
    %c0_i32 = arith.constant 0 : i32
    %c0_i32_0 = arith.constant 0 : i32
    return %arg0, %arg1, %c0_i32 : i32, i32, i32
  }
  func.func @transform_2(%arg0: i32, %arg1: i32) -> (i32, i32, i32) {
    %c0_i32 = arith.constant 0 : i32
    %c0_i32_0 = arith.constant 0 : i32
    return %arg0, %arg1, %c0_i32 : i32, i32, i32
  }
}

</mosaic_0001>

<bundles_post_ra>
// kernel: tpu_custom_call.1
= control target key start
LH: loop header
LB: loop body
LE: loop exit
PB: predicated region body
PF: predicated region fallthrough
CT: control target
= control target key end

     0   :  { %7 = vsyncpa [#allocation3], 0  ;;  %s631_s0 = inlined_call_operand.vmem [shape: f32[2,5,256], index: 0, kind: input, shape index: {}]   ;;  %s632_s1 = inlined_call_operand.vmem [shape: f32[2,4,256], index: 1, kind: input, shape index: {}]   ;;  %s633_s2 = inlined_call_operand.hbm [shape: f32[2,4,5], index: 2, kind: output, shape index: {}]  }
   0x1   :  { %9 = vsyncpa [#allocation3 + $0x1], 0  ;;  %s516_s9 = smov 0   ;;  %s518_s10 = smov 0  }
   0x2   :  { %s520_s11 = smov 0   ;;  %s522_s12 = smov 0  }
   0x3   :  { %s524_s13 = smov 0   ;;  %s526_s14 = smov 0  }
   0x4 LB: > { %s348_s15 = sadd.s32 4294967295, %s498_s14   ;;  %s349_s16 = sadd.s32 4294967294, %s498_s14   ;;  %s498_s14 = sphi %s526_s14, %s15_s14   ;;  %s494_s13 = sphi %s524_s13, %s640_s13   ;;  %s490_s12 = sphi %s522_s12, %s639_s12   ;;  %s486_s11 = sphi %s520_s11, %s638_s11   ;;  %s482_s10 = sphi %s518_s10, %s637_s10   ;;  %s478_s9 = sphi %s516_s9, %s636_s9  }
   0x5   : > { %s27_s17 = sadd.s32 1, %s494_s13  ;;  %s90_s18 = sadd.s32 1, %s486_s11 }
   0x6   : > { %p29_p0 = scmp.ge.s32.totalorder %s27_s17, 2  ;;  %p100_p1 = scmp.ne.s32.totalorder %s486_s11, %s482_s10 }
   0x7   : > { %p101_p2 = scmp.eq.s32.totalorder %s348_s15, 1  ;;  %p106_p3 = scmp.ne.s32.totalorder %s482_s10, %s478_s9 }
   0x8   : > { %s642_s17 = smov (%p29_p0, %s27_s17), 0  ;;  %p107_p5 = scmp.eq.s32.totalorder %s349_s16, 1 }
   0x9   : > { %p556_p4 = por %p101_p2, %p100_p1  ;;  %s85_s20 = ssub.s32 %s494_s13, %s642_s17 }
   0xa   : > { %p352_p6 = scmp.ge.s32.totalorder %s498_s14, 1  ;;  %p88_p7 = scmp.eq.s32.totalorder %s85_s20, 0 }
   0xb   : > { %p563_p8 = por %p107_p5, %p106_p3  ;;  %p145_p9 = scmp.lt.s32.totalorder %s498_s14, 3 }
   0xc   : > { %s569_s22 = scalar_select %p88_p7, %s486_s11, %s90_s18  }
   0xd   : > { %p146_p10 = pnand %p352_p6, %p145_p9 }
   0xe   : > { %p176_p11 = scmp.lt.s32.totalorder (!%p146_p10), %s490_s12, 1  ;;  %s173_s4 = sand.u32 (!%p146_p10), 1, %s482_s10   ;;  %vm242_vm0 = vcmask (!%p146_p10), 35840  }
   0xf   : > { %149 = sbr.rel (%p146_p10) target bundleno = 265 (0x109), region = 28  ;;  %s353_s5 = sshll.u32 (!%p146_p10), %s173_s4, 2 }
  0x10   : > { %s359_s6 = sshll.u32 (!%p146_p10), %s490_s12, 6  ;;  %s175_s7 = scalar_lea.vmem (!%p146_p10), [#allocation2], %s353_s5 }
  0x11   : > { %s259_s8 = sshll.u32 (!%p146_p10), %s175_s7, 4  ;;  %s584_s18 = scalar_lea.hbm (!%p146_p10), %s633_s2, %s359_s6  ;;  %s586_s8 = int_to_ptr.vmem [resolvable:$true] %s259_s8 }
  0x12   : > { %s420_s20 = scalar_lea.vmem (!%p146_p10), %s586_s8, 64 }
  0x13   : > { %p421_p12 = scmp.ne.s32.totalorder (!%p146_p10), %s586_s8, %s420_s20 }
  0x15   : > { %p422_p13 = pnand (!%p146_p10), %p421_p12, %p556_p4 }
  0x16   : > { %s177_s23 = scalar_select %p176_p11, %s490_s12, 1 }
  0x17   : > { %s245_s12 = scalar_lea.sflag [#allocation3], %s173_s4  ;;  %p423_p0 = pneg %p422_p13 }
  0x18   : > { %s362_s24 = sshll.u32 %s177_s23, 4  ;;  %s363_s25 = sshll.u32 %s177_s23, 3 }
  0x19   : > { %s180_s28 = scalar_lea.vmem %s631_s0, %s362_s24  ;;  %s189_s3 = scalar_lea.vmem %s632_s1, %s363_s25 }
  0x1a   : > { %v198_v0 = vld [vmem:[%s180_s28 + $0x8] sm:$0x1f]  ;;  %v197_v1 = vld [vmem:[%s180_s28] sm:$0x1f]  ;;  %s500_s23 = smov [#allocation2]  }
  0x1b   : > { %v191_v2 = vld [vmem:[%s189_s3] sm:$0xff]  ;;  %v200_v3 = vpack.c.bf16 %v198_v0, %v198_v0  ;;  %v199_v4 = vpack.c.bf16 %v197_v1, %v197_v1  ;;  %s424_s24 = sshll.u32 %s500_s23, 4  ;;  %s425_s24 = int_to_ptr.vmem [resolvable:$false] %s424_s24 }
  0x1c   : > { %v193_v5 = vcombine.high %v191_v2, %v191_v2  ;;  %v195_v7 = vpack.c.bf16 %v191_v2, %v191_v2  ;;  %s426_s25 = scalar_lea.vmem %s425_s24, 128  ;;  %p427_p1 = scmp.lt.s32.totalorder %s586_s8, %s425_s24 }
  0x1d   : > { %201 = vmatprep.subr.bf16.mxu0 %v200_v3  ;;  %p428_p2 = scmp.lt.s32.totalorder %s426_s25, %s420_s20 }
  0x1e   : > { %v196_v6 = vpack.c.bf16 %v193_v5, %v193_v5  ;;  %202 = vmatpush1.bf16.xpose.msra.mxu0 %v199_v4 }
  0x1f   : > { %p429_p3 = por %p428_p2, %p427_p1 }
  0x20   : > { %233 = vmatprep.mubr.bf16.mxu0 %v196_v6 }
  0x21   : > { %p430_p5 = pnand %p429_p3, %p423_p0 }
  0x25   : > { %234 = vmatmul.mubr.bf16.vlgmr.msra.gmra.mrb[0].mxu0 %v195_v7 }
  0xf8   : > { %v235_v8 = vpop.f32.mrb[0].mxu0 }
  0xf9   : > { %v241_v9 = vmul.f32 0.00390625, %v235_v8  ;;  %v237_v10 = vpop.f32.mrb[1].mxu0 }
  0xfa   : > { %v238_v11 = vpop.f32.mrb[2].mxu0 }
  0xfb   : > { %v239_v12 = vpop.f32.mrb[3].mxu0  ;;  %243 = vst.msk [vmem:[%s175_s7] sm:$0xf] %vm242_vm0, %v241_v9 }
  0xfc   : > { %433 = shalt.err (!%p430_p5)
}
  0xfd   : > { %s434_s26 = scalar_lea.hbm %s584_s18, 64  ;;  %s438_s29 = scalar_lea.hbm %s633_s2, 128 }
  0xfe   : > { %p435_p6 = scmp.ne.s32.totalorder %s584_s18, %s434_s26  ;;  %p439_p10 = scmp.lt.u32.totalorder %s584_s18, %s633_s2 }
  0xff   : > { %p440_p11 = scmp.lt.u32.totalorder %s438_s29, %s434_s26  ;;  %p442_p13 = scmp.lt.u32.totalorder %s434_s26, %s584_s18 }
 0x100   : > { %p436_p7 = pnand %p435_p6, %p556_p4 }
 0x101   : > { %p441_p12 = por %p440_p11, %p439_p10 }
 0x102   : > { %p437_p9 = pneg %p436_p7 }
 0x103   : > { %p443_p0 = por %p442_p13, %p441_p12 }
 0x105   : > { %p444_p1 = pnand %p443_p0, %p437_p9 }
 0x107   : > { %447 = shalt.err (!%p444_p1)
}
 0x108   : > { %364 = dma.vmem_to_hbm [thread:$0]  (%p556_p4), %s586_s8, 64, %s584_s18, %s245_s12  }
 0x109 PF: > { %p370_p2 = scmp.ge.s32.totalorder %s498_s14, 2  ;;  %s271_s4 = sand.u32 1, %s478_s9  }
 0x10a   : > { %s272_s5 = scalar_lea.sflag [#allocation3], %s271_s4 }
 0x10b   : > { %p367_p3 = pnand %p370_p2, %p563_p8 }
 0x10d   : > { %473 = dma.done.wait (!%p367_p3), %s272_s5, 64  }
 0x10e   : > { %475 = vsyncadd (!%p367_p3), %s272_s5, 4294967232  ;;  %s15_s14 = sadd.s32 1, %s498_s14   ;;  %s636_s9 = smov %s482_s10 }
 0x10f   : > { %p12_p5 = scmp.ge.s32.totalorder %s15_s14, 4   ;;  %s637_s10 = smov %s486_s11 }
 0x110   : > { %s638_s11 = smov %s569_s22  ;;  %s639_s12 = smov %s494_s13 }
 0x111   : > { %s640_s13 = smov %s642_s17  ;;  %14 = sbr.rel (!%p12_p5) target bundleno = 4 (0x4), region = 66 }
 0x118   :  { %277 = vsyncpa [#allocation3], 1 }
 0x119   :  { %279 = vsyncpa [#allocation3 + $0x1], 1 }

</bundles_post_ra>
